<compile_context>
chip_gen: v7x
topology: tpu7x:2x2x1
jax: 0.10.0
libtpu: 0.0.40
codegen_flags: <defaults>
</compile_context>

<pallas_src>
import functools
import math

import jax
import jax.numpy as jnp
from jax.experimental import pallas as pl
from jax.experimental.pallas import tpu as pltpu


def _round_up(x, m):
    return ((x + m - 1) // m) * m


def _pad2d(a, rows, cols):
    return jnp.pad(a, ((0, rows - a.shape[0]), (0, cols - a.shape[1])))


def mlp_logsoftmax_kernel(x_ref, w1_ref, b1_ref, w2_ref, b2_ref, w3_ref, b3_ref,
                          out_ref, *, dim_out):
    # Layer 1: Linear(dim_in, H) + ReLU. bf16 operands, f32 accumulate.
    h = jnp.dot(x_ref[...], w1_ref[...],
                preferred_element_type=jnp.float32) + b1_ref[...]
    h = jnp.maximum(h, 0.0).astype(jnp.bfloat16)

    # Layer 2: Linear(H, H) + ReLU (the single hidden layer of the module).
    h = jnp.dot(h, w2_ref[...],
                preferred_element_type=jnp.float32) + b2_ref[...]
    h = jnp.maximum(h, 0.0).astype(jnp.bfloat16)

    # Output layer: Linear(H, dim_out_padded).
    logits = jnp.dot(h, w3_ref[...],
                     preferred_element_type=jnp.float32) + b3_ref[...]

    # Mask the padded logit lanes (>= dim_out) so they don't leak into the
    # log-softmax reductions.
    lane = jax.lax.broadcasted_iota(jnp.int32, logits.shape, dimension=1)
    logits = jnp.where(lane < dim_out, logits, jnp.float32(-1e30))

    # Numerically stable log-softmax over dim=1.
    m = jnp.max(logits, axis=1, keepdims=True)
    shifted = logits - m
    lse = jnp.log(jnp.sum(jnp.exp(shifted), axis=1, keepdims=True))
    out_ref[...] = (shifted - lse).astype(out_ref.dtype)


def nn_forward(x, params):
    """x: any shape whose trailing flatten gives (-1, dim_in). Returns (B, dim_out) f32."""
    w1, b1, w2, b2, w3, b3 = params
    dim_in = w1.shape[0]
    dim_out = w3.shape[1]

    # Pad hidden dim to a multiple of 128 (200 -> 256) and output dim to 128.
    # Zero padding preserves semantics: padded hidden features are ReLU(0)=0 and
    # contribute nothing downstream; padded logit lanes are masked in-kernel.
    Hp = _round_up(max(w1.shape[1], w2.shape[1]), 128)
    Dp = _round_up(dim_out, 128)

    w1p = _pad2d(w1, dim_in, Hp).astype(jnp.bfloat16)
    b1p = _pad2d(b1, 1, Hp).astype(jnp.float32)
    w2p = _pad2d(w2, Hp, Hp).astype(jnp.bfloat16)
    b2p = _pad2d(b2, 1, Hp).astype(jnp.float32)
    w3p = _pad2d(w3, Hp, Dp).astype(jnp.bfloat16)
    b3p = _pad2d(b3, 1, Dp).astype(jnp.float32)

    x2d = x.reshape(-1, dim_in)
    B = x2d.shape[0]
    # Batch tile: 512 rows (multiple of 128 for v5e MXU M-alignment) for large
    # batches; for tiny batches just round up to the 8-sublane granule.
    TB = 512 if B >= 512 else _round_up(B, 8)
    B_pad = _round_up(B, TB)
    x2d = jnp.pad(x2d, ((0, B_pad - B), (0, 0))).astype(jnp.bfloat16)

    kernel = functools.partial(mlp_logsoftmax_kernel, dim_out=dim_out)

    out = pl.pallas_call(
        kernel,
        out_shape=jax.ShapeDtypeStruct((B_pad, Dp), jnp.float32),
        grid_spec=pl.GridSpec(
            grid=(B_pad // TB,),
            in_specs=[
                pl.BlockSpec((TB, dim_in), lambda i: (i, 0)),   # x tile
                pl.BlockSpec((dim_in, Hp), lambda i: (0, 0)),   # w1 (resident)
                pl.BlockSpec((1, Hp), lambda i: (0, 0)),        # b1
                pl.BlockSpec((Hp, Hp), lambda i: (0, 0)),       # w2
                pl.BlockSpec((1, Hp), lambda i: (0, 0)),        # b2
                pl.BlockSpec((Hp, Dp), lambda i: (0, 0)),       # w3
                pl.BlockSpec((1, Dp), lambda i: (0, 0)),        # b3
            ],
            out_specs=pl.BlockSpec((TB, Dp), lambda i: (i, 0)),
        ),
        compiler_params=pltpu.CompilerParams(
            dimension_semantics=("parallel",),
        ),
    )(x2d, w1p, b1p, w2p, b2p, w3p, b3p)

    return out[:B, :dim_out]


def nn_reference(x, params):
    """Pure-JAX reference with matching bf16-operand / f32-accumulate arithmetic."""
    w1, b1, w2, b2, w3, b3 = params
    x2d = x.reshape(-1, w1.shape[0]).astype(jnp.bfloat16)
    h = jnp.dot(x2d, w1.astype(jnp.bfloat16),
                preferred_element_type=jnp.float32) + b1
    h = jnp.maximum(h, 0.0).astype(jnp.bfloat16)
    h = jnp.dot(h, w2.astype(jnp.bfloat16),
                preferred_element_type=jnp.float32) + b2
    h = jnp.maximum(h, 0.0).astype(jnp.bfloat16)
    logits = jnp.dot(h, w3.astype(jnp.bfloat16),
                     preferred_element_type=jnp.float32) + b3
    return jax.nn.log_softmax(logits, axis=1)


def init_params(key, dim_in, dim_out, hidden=(200, 200)):
    """Deterministic init mimicking PyTorch nn.Linear default (U[-1/sqrt(fan_in), 1/sqrt(fan_in)])."""
    dims = [dim_in, hidden[0], hidden[1], dim_out]
    params = []
    for i in range(3):
        fan_in, fan_out = dims[i], dims[i + 1]
        key, kw, kb = jax.random.split(key, 3)
        bound = 1.0 / math.sqrt(fan_in)
        w = jax.random.uniform(kw, (fan_in, fan_out), jnp.float32, -bound, bound)
        b = jax.random.uniform(kb, (1, fan_out), jnp.float32, -bound, bound)
        params.extend([w, b])
    return tuple(params)


if __name__ == "__main__":
    dim_in, dim_out = 32, 10
    batch = 8

    key = jax.random.PRNGKey(0)
    key, kx = jax.random.split(key)
    x = jax.random.normal(kx, (batch, dim_in), jnp.float32)

    params = init_params(jax.random.PRNGKey(0), dim_in, dim_out)

    out = nn_forward(x, params)
    out = jax.block_until_ready(out)

    # sanity 1: shape and log-softmax rows exp-sum to 1
    assert out.shape == (batch, dim_out)
    row_sums = jnp.exp(out).sum(axis=1)
    assert bool(jnp.all(jnp.abs(row_sums - 1.0) < 1e-4))

    # sanity 2: matches pure-JAX reference with the same bf16/f32 arithmetic
    ref = nn_reference(x, params)
    max_err = float(jnp.max(jnp.abs(out - ref)))
    assert max_err < 1e-3, f"max abs error vs reference: {max_err}"

    print("KERNEL_OK")
</pallas_src>

<mosaic_0001>
module attributes {stable_mosaic.version = 11 : i64} {
  func.func @mlp_logsoftmax_kernel(%arg0: i32, %arg1: memref<8x32xbf16, #tpu.memory_space<vmem>>, %arg2: memref<32x256xbf16, #tpu.memory_space<vmem>>, %arg3: memref<1x256xf32, #tpu.memory_space<vmem>>, %arg4: memref<256x256xbf16, #tpu.memory_space<vmem>>, %arg5: memref<1x256xf32, #tpu.memory_space<vmem>>, %arg6: memref<256x128xbf16, #tpu.memory_space<vmem>>, %arg7: memref<1x128xf32, #tpu.memory_space<vmem>>, %arg8: memref<8x128xf32, #tpu.memory_space<vmem>>) attributes {dimension_semantics = [#tpu.dimension_semantics<parallel>], iteration_bounds = array<i64: 1>, scalar_prefetch = 0 : i64, scratch_operands = 0 : i64, tpu.core_type = #tpu.core_type<tc>, window_params = [{transform_indices = @transform_0, window_bounds = array<i64: 8, 32>}, {pipeline_mode = #tpu.pipeline_mode<synchronous>, transform_indices = @transform_1, window_bounds = array<i64: 32, 256>}, {pipeline_mode = #tpu.pipeline_mode<synchronous>, transform_indices = @transform_2, window_bounds = array<i64: 1, 256>}, {pipeline_mode = #tpu.pipeline_mode<synchronous>, transform_indices = @transform_3, window_bounds = array<i64: 256, 256>}, {pipeline_mode = #tpu.pipeline_mode<synchronous>, transform_indices = @transform_4, window_bounds = array<i64: 1, 256>}, {pipeline_mode = #tpu.pipeline_mode<synchronous>, transform_indices = @transform_5, window_bounds = array<i64: 256, 128>}, {pipeline_mode = #tpu.pipeline_mode<synchronous>, transform_indices = @transform_6, window_bounds = array<i64: 1, 128>}, {transform_indices = @transform_7, window_bounds = array<i64: 8, 128>}]} {
    %c0 = arith.constant 0 : index
    %c0_0 = arith.constant 0 : index
    %0 = vector.load %arg1[%c0, %c0_0] : memref<8x32xbf16, #tpu.memory_space<vmem>>, vector<8x32xbf16>
    %c0_1 = arith.constant 0 : index
    %c0_2 = arith.constant 0 : index
    %1 = vector.load %arg2[%c0_1, %c0_2] : memref<32x256xbf16, #tpu.memory_space<vmem>>, vector<32x256xbf16>
    %cst = arith.constant dense<0.000000e+00> : vector<8x256xf32>
    %2 = tpu.matmul %0, %1, %cst {dimension_numbers = #tpu.dot_dimension_numbers<[1], [0], [0], [1], [0, 0, 1, 1], [], []>} : vector<8x32xbf16>, vector<32x256xbf16>, vector<8x256xf32> -> vector<8x256xf32>
    %c0_3 = arith.constant 0 : index
    %c0_4 = arith.constant 0 : index
    %3 = vector.load %arg3[%c0_3, %c0_4] : memref<1x256xf32, #tpu.memory_space<vmem>>, vector<1x256xf32>
    %4 = vector.broadcast %3 : vector<1x256xf32> to vector<8x256xf32>
    %5 = arith.addf %2, %4 : vector<8x256xf32>
    %cst_5 = arith.constant 0.000000e+00 : f32
    %6 = vector.broadcast %cst_5 : f32 to vector<8x256xf32>
    %7 = arith.maximumf %5, %6 : vector<8x256xf32>
    %8 = arith.truncf %7 : vector<8x256xf32> to vector<8x256xbf16>
    %c0_6 = arith.constant 0 : index
    %c0_7 = arith.constant 0 : index
    %9 = vector.load %arg4[%c0_6, %c0_7] : memref<256x256xbf16, #tpu.memory_space<vmem>>, vector<256x256xbf16>
    %cst_8 = arith.constant dense<0.000000e+00> : vector<8x256xf32>
    %10 = tpu.matmul %8, %9, %cst_8 {dimension_numbers = #tpu.dot_dimension_numbers<[1], [0], [0], [1], [0, 0, 1, 1], [], []>} : vector<8x256xbf16>, vector<256x256xbf16>, vector<8x256xf32> -> vector<8x256xf32>
    %c0_9 = arith.constant 0 : index
    %c0_10 = arith.constant 0 : index
    %11 = vector.load %arg5[%c0_9, %c0_10] : memref<1x256xf32, #tpu.memory_space<vmem>>, vector<1x256xf32>
    %12 = vector.broadcast %11 : vector<1x256xf32> to vector<8x256xf32>
    %13 = arith.addf %10, %12 : vector<8x256xf32>
    %cst_11 = arith.constant 0.000000e+00 : f32
    %14 = vector.broadcast %cst_11 : f32 to vector<8x256xf32>
    %15 = arith.maximumf %13, %14 : vector<8x256xf32>
    %16 = arith.truncf %15 : vector<8x256xf32> to vector<8x256xbf16>
    %c0_12 = arith.constant 0 : index
    %c0_13 = arith.constant 0 : index
    %17 = vector.load %arg6[%c0_12, %c0_13] : memref<256x128xbf16, #tpu.memory_space<vmem>>, vector<256x128xbf16>
    %cst_14 = arith.constant dense<0.000000e+00> : vector<8x128xf32>
    %18 = tpu.matmul %16, %17, %cst_14 {dimension_numbers = #tpu.dot_dimension_numbers<[1], [0], [0], [1], [0, 0, 1, 1], [], []>} : vector<8x256xbf16>, vector<256x128xbf16>, vector<8x128xf32> -> vector<8x128xf32>
    %c0_15 = arith.constant 0 : index
    %c0_16 = arith.constant 0 : index
    %19 = vector.load %arg7[%c0_15, %c0_16] : memref<1x128xf32, #tpu.memory_space<vmem>>, vector<1x128xf32>
    %20 = vector.broadcast %19 : vector<1x128xf32> to vector<8x128xf32>
    %21 = arith.addf %18, %20 : vector<8x128xf32>
    %22 = tpu.iota {dimensions = array<i32: 1>} : vector<8x128xi32>
    %c10_i32 = arith.constant 10 : i32
    %23 = vector.broadcast %c10_i32 : i32 to vector<8x128xi32>
    %24 = arith.cmpi slt, %22, %23 : vector<8x128xi32>
    %cst_17 = arith.constant -1.000000e+30 : f32
    %25 = vector.broadcast %cst_17 : f32 to vector<8x128xf32>
    %26 = arith.select %24, %21, %25 : vector<8x128xi1>, vector<8x128xf32>
    %cst_18 = arith.constant dense<0xFF800000> : vector<8xf32>
    %27 = vector.multi_reduction <maximumf>, %26, %cst_18 [1] : vector<8x128xf32> to vector<8xf32>
    %28 = vector.shape_cast %27 : vector<8xf32> to vector<8x1xf32>
    %29 = vector.broadcast %28 : vector<8x1xf32> to vector<8x128xf32>
    %30 = arith.subf %26, %29 : vector<8x128xf32>
    %31 = math.exp %30 : vector<8x128xf32>
    %cst_19 = arith.constant dense<0.000000e+00> : vector<8xf32>
    %32 = vector.multi_reduction <add>, %31, %cst_19 [1] : vector<8x128xf32> to vector<8xf32>
    %33 = vector.shape_cast %32 : vector<8xf32> to vector<8x1xf32>
    %34 = math.log %33 : vector<8x1xf32>
    %35 = vector.broadcast %34 : vector<8x1xf32> to vector<8x128xf32>
    %36 = arith.subf %30, %35 : vector<8x128xf32>
    %c0_20 = arith.constant 0 : index
    %c0_21 = arith.constant 0 : index
    %37 = vector.load %arg8[%c0_20, %c0_21] : memref<8x128xf32, #tpu.memory_space<vmem>>, vector<8x128xf32>
    tpu.vector_store %arg8[%c0_20, %c0_21], %36 {strides = array<i32>} : memref<8x128xf32, #tpu.memory_space<vmem>>, vector<8x128xf32>,
    return
  }
  func.func @transform_0(%arg0: i32) -> (i32, i32) {
    %c0_i32 = arith.constant 0 : i32
    %c0_i32_0 = arith.constant 0 : i32
    return %arg0, %c0_i32 : i32, i32
  }
  func.func @transform_1(%arg0: i32) -> (i32, i32) {
    %c0_i32 = arith.constant 0 : i32
    %c0_i32_0 = arith.constant 0 : i32
    %c0_i32_1 = arith.constant 0 : i32
    return %c0_i32, %c0_i32_0 : i32, i32
  }
  func.func @transform_2(%arg0: i32) -> (i32, i32) {
    %c0_i32 = arith.constant 0 : i32
    %c0_i32_0 = arith.constant 0 : i32
    %c0_i32_1 = arith.constant 0 : i32
    return %c0_i32, %c0_i32_0 : i32, i32
  }
  func.func @transform_3(%arg0: i32) -> (i32, i32) {
    %c0_i32 = arith.constant 0 : i32
    %c0_i32_0 = arith.constant 0 : i32
    %c0_i32_1 = arith.constant 0 : i32
    return %c0_i32, %c0_i32_0 : i32, i32
  }
  func.func @transform_4(%arg0: i32) -> (i32, i32) {
    %c0_i32 = arith.constant 0 : i32
    %c0_i32_0 = arith.constant 0 : i32
    %c0_i32_1 = arith.constant 0 : i32
    return %c0_i32, %c0_i32_0 : i32, i32
  }
  func.func @transform_5(%arg0: i32) -> (i32, i32) {
    %c0_i32 = arith.constant 0 : i32
    %c0_i32_0 = arith.constant 0 : i32
    %c0_i32_1 = arith.constant 0 : i32
    return %c0_i32, %c0_i32_0 : i32, i32
  }
  func.func @transform_6(%arg0: i32) -> (i32, i32) {
    %c0_i32 = arith.constant 0 : i32
    %c0_i32_0 = arith.constant 0 : i32
    %c0_i32_1 = arith.constant 0 : i32
    return %c0_i32, %c0_i32_0 : i32, i32
  }
  func.func @transform_7(%arg0: i32) -> (i32, i32) {
    %c0_i32 = arith.constant 0 : i32
    %c0_i32_0 = arith.constant 0 : i32
    return %arg0, %c0_i32 : i32, i32
  }
}

</mosaic_0001>

<bundles_post_ra>
// kernel: tpu_custom_call.1
= control target key start
LH: loop header
LB: loop body
LE: loop exit
PB: predicated region body
PF: predicated region fallthrough
CT: control target
= control target key end

     0   :  { %12 = vsyncpa [#allocation3], 0  ;;  %s1026_s0 = inlined_call_operand.hbm [shape: bf16[8,32], index: 0, kind: input, shape index: {}]   ;;  %s1027_s1 = inlined_call_operand.hbm [shape: bf16[32,256], index: 1, kind: input, shape index: {}]   ;;  %s1028_s2 = inlined_call_operand.vmem [shape: f32[1,256], index: 2, kind: input, shape index: {}]   ;;  %s1029_s3 = inlined_call_operand.hbm [shape: bf16[256,256], index: 3, kind: input, shape index: {}]   ;;  %s1030_s4 = inlined_call_operand.vmem [shape: f32[1,256], index: 4, kind: input, shape index: {}]   ;;  %s1031_s5 = inlined_call_operand.hbm [shape: bf16[256,128], index: 5, kind: input, shape index: {}]   ;;  %s1032_s6 = inlined_call_operand.vmem [shape: f32[1,128], index: 6, kind: input, shape index: {}]   ;;  %s1033_s7 = inlined_call_operand.hbm [shape: f32[8,128], index: 7, kind: output, shape index: {}]  }
   0x1   :  { %13 = vsyncpa [#allocation6], 0 }
   0x2   :  { %14 = vsyncpa [#allocation9], 0 }
   0x3   :  { %15 = vsyncpa [#allocation4], 0  ;;  %s901_s24 = smov [#allocation5]   ;;  %s783_s28 = scalar_lea.hbm %s1027_s1, 512 }
   0x4   :  { %s31_s25 = sshll.u32 %s901_s24, 4  ;;  %p784_p0 = scmp.ne.s32.totalorder %s1027_s1, %s783_s28  ;;  %s32_s25 = int_to_ptr.vmem [resolvable:$true] %s31_s25 }
   0x5   :  { %p787_p1 = scmp.lt.u32.totalorder %s783_s28, %s1027_s1 }
   0x7   :  { %p789_p2 = pnand %p787_p1, %p784_p0 }
   0x9   :  { %792 = shalt.err (!%p789_p2)
}
   0xa   :  { %s793_s10 = scalar_lea.vmem %s32_s25, 512  ;;  %p798_p4 = scmp.lt.s32.totalorder %s32_s25, %s32_s25 }
   0xb   :  { %p794_p3 = scmp.ne.s32.totalorder %s32_s25, %s793_s10  ;;  %p799_p5 = scmp.lt.s32.totalorder %s793_s10, %s793_s10 }
   0xd   :  { %p800_p6 = por %p799_p5, %p798_p4 }
   0xf   :  { %p801_p7 = pnand %p800_p6, %p794_p3 }
  0x11   :  { %804 = shalt.err (!%p801_p7)
}
  0x12   :  { %s902_s11 = smov 128   ;;  %s903_s12 = smov 8  }
  0x13   :  { %37 = dma.hbm_to_vmem [thread:$0]  %s1027_s1, 512, %s32_s25, [#allocation6], %s902_s11, %s902_s11, %s903_s12  }
  0x14   :  { %s904_s15 = smov [#allocation2]   ;;  %s905_s17 = smov [#allocation7]  }
  0x15   :  { %s22_s16 = sshll.u32 %s904_s15, 4  ;;  %s45_s18 = sshll.u32 %s905_s17, 4  ;;  %s23_s16 = int_to_ptr.vmem [resolvable:$true] %s22_s16  ;;  %s46_s18 = int_to_ptr.vmem [resolvable:$true] %s45_s18 }
  0x16   :  { %s805_s21 = scalar_lea.hbm %s1026_s0, 64 }
  0x17   :  { %p806_p8 = scmp.ne.s32.totalorder %s1026_s0, %s805_s21  ;;  %p809_p9 = scmp.lt.u32.totalorder %s805_s21, %s1026_s0 }
  0x19   :  { %p811_p10 = pnand %p809_p9, %p806_p8 }
  0x1b   :  { %814 = shalt.err (!%p811_p10)
}
  0x1c   :  { %s815_s1 = scalar_lea.vmem %s23_s16, 64  ;;  %p820_p12 = scmp.lt.s32.totalorder %s23_s16, %s23_s16 }
  0x1d   :  { %p816_p11 = scmp.ne.s32.totalorder %s23_s16, %s815_s1  ;;  %p821_p13 = scmp.lt.s32.totalorder %s815_s1, %s815_s1 }
  0x1f   :  { %p822_p0 = por %p821_p13, %p820_p12 }
  0x21   :  { %p823_p1 = pnand %p822_p0, %p816_p11 }
  0x23   :  { %826 = shalt.err (!%p823_p1)
}
  0x24   :  { %25 = dma.hbm_to_vmem [thread:$0]  %s1026_s0, 64, %s23_s16, [#allocation3]  }
  0x25   :  { %s827_s30 = scalar_lea.hbm %s1029_s3, 4096 }
  0x26   :  { %p828_p2 = scmp.ne.s32.totalorder %s1029_s3, %s827_s30  ;;  %p831_p3 = scmp.lt.u32.totalorder %s827_s30, %s1029_s3 }
  0x28   :  { %p833_p4 = pnand %p831_p3, %p828_p2 }
  0x2a   :  { %836 = shalt.err (!%p833_p4)
}
  0x2b   :  { %s837_s14 = scalar_lea.vmem %s46_s18, 4096  ;;  %p842_p6 = scmp.lt.s32.totalorder %s46_s18, %s46_s18 }
  0x2c   :  { %p838_p5 = scmp.ne.s32.totalorder %s46_s18, %s837_s14  ;;  %p843_p7 = scmp.lt.s32.totalorder %s837_s14, %s837_s14 }
  0x2e   :  { %p844_p8 = por %p843_p7, %p842_p6 }
  0x30   :  { %p845_p9 = pnand %p844_p8, %p838_p5 }
  0x32   :  { %848 = shalt.err (!%p845_p9)
}
  0x33   :  { %51 = dma.hbm_to_vmem [thread:$0]  %s1029_s3, 4096, %s46_s18, [#allocation6], %s902_s11, %s902_s11, %s903_s12  }
  0x34   :  { %s906_s16 = smov [#allocation8]   ;;  %s849_s21 = scalar_lea.hbm %s1031_s5, 2048 }
  0x35   :  { %s59_s17 = sshll.u32 %s906_s16, 4  ;;  %p850_p10 = scmp.ne.s32.totalorder %s1031_s5, %s849_s21  ;;  %s60_s17 = int_to_ptr.vmem [resolvable:$true] %s59_s17 }
  0x36   :  { %p853_p11 = scmp.lt.u32.totalorder %s849_s21, %s1031_s5 }
  0x38   :  { %p855_p12 = pnand %p853_p11, %p850_p10 }
  0x3a   :  { %858 = shalt.err (!%p855_p12)
}
  0x3b   :  { %s859_s1 = scalar_lea.vmem %s60_s17, 2048  ;;  %p864_p0 = scmp.lt.s32.totalorder %s60_s17, %s60_s17 }
  0x3c   :  { %p860_p13 = scmp.ne.s32.totalorder %s60_s17, %s859_s1  ;;  %p865_p1 = scmp.lt.s32.totalorder %s859_s1, %s859_s1 }
  0x3e   :  { %p866_p2 = por %p865_p1, %p864_p0 }
  0x40   :  { %p867_p3 = pnand %p866_p2, %p860_p13 }
  0x42   :  { %870 = shalt.err (!%p867_p3)
}
  0x43   :  { %s907_s3 = smov 64   ;;  %s908_s11 = smov 4  }
  0x44   :  { %65 = dma.hbm_to_vmem [thread:$0]  %s1031_s5, 2048, %s60_s17, [#allocation9], %s907_s3, %s907_s3, %s908_s11  }
  0x45   :  { %893 = dma.done.wait [#allocation3], 64  }
  0x46   :  { %894 = vsyncadd [#allocation3], 4294967232 }
  0x47   :  { %895 = dma.done.wait [#allocation6], 4608  }
  0x48   :  { %896 = vsyncadd [#allocation6], 4294962688 }
  0x49   :  { %897 = dma.done.wait [#allocation9], 2048  }
  0x4a   :  { %898 = vsyncadd [#allocation9], 4294965248  ;;  %v909_v0 = vmov 0   ;;  %v709_v1 = vld [vmem:[#allocation5 + $0x4] ss:$8 sps:$4 sm:$0xff]   ;;  %vm118_vm0 = vcmask 261120   ;;  %v88_v50 = vlaneseq }
  0x4b   :  { %154 = vmatprep.mubr.bf16.mxu0 %v909_v0  ;;  %v711_v2 = vld [vmem:[#allocation5] ss:$8 sps:$4 sm:$0xff]   ;;  %122 = vmatprep.subr.bf16.mxu0 %v709_v1  ;;  %v712_v3 = vld [vmem:[#allocation5 + $0x14] ss:$8 sps:$4 sm:$0xff]   ;;  %v714_v4 = vld [vmem:[#allocation5 + $0x10] ss:$8 sps:$4 sm:$0xff]  }
  0x4c   :  { %123 = vmatpush1.bf16.msra.mxu0 %v711_v2  ;;  %v715_v5 = vld [vmem:[#allocation7 + $0x4] ss:$8 sps:$4 sm:$0xff]   ;;  %v717_v6 = vld [vmem:[#allocation7] ss:$8 sps:$4 sm:$0xff]   ;;  %v718_v7 = vld [vmem:[#allocation7 + $0x14] ss:$8 sps:$4 sm:$0xff]  }
  0x4d   :  { %124 = vmatprep.subr.bf16.mxu0 %v712_v3  ;;  %371 = vmatprep.subr.bf16.mxu1 %v715_v5  ;;  %v81_v8 = vld [vmem:[#allocation2] sm:$0xf]  ;;  %v720_v9 = vld [vmem:[#allocation7 + $0x10] ss:$8 sps:$4 sm:$0xff]   ;;  %v721_v10 = vld [vmem:[#allocation7 + $0x24] ss:$8 sps:$4 sm:$0xff]  }
  0x4e   :  { %372 = vmatpush1.bf16.msra.mxu1 %v717_v6  ;;  %v723_v11 = vld [vmem:[#allocation7 + $0x20] ss:$8 sps:$4 sm:$0xff]   ;;  %v724_v12 = vld [vmem:[#allocation7 + $0x34] ss:$8 sps:$4 sm:$0xff]   ;;  %v726_v13 = vld [vmem:[#allocation7 + $0x30] ss:$8 sps:$4 sm:$0xff]  }
  0x4f   :  { %373 = vmatprep.subr.bf16.mxu1 %v718_v7  ;;  %v727_v14 = vld [vmem:[#allocation7 + $0x44] ss:$8 sps:$4 sm:$0xff]   ;;  %v729_v15 = vld [vmem:[#allocation7 + $0x40] ss:$8 sps:$4 sm:$0xff]   ;;  %v730_v16 = vld [vmem:[#allocation7 + $0x54] ss:$8 sps:$4 sm:$0xff]  }
  0x50   :  { %125 = vmatpush1.bf16.msra.mxu0 %v714_v4  ;;  %v732_v17 = vld [vmem:[#allocation7 + $0x50] ss:$8 sps:$4 sm:$0xff]   ;;  %v733_v18 = vld [vmem:[#allocation7 + $0x64] ss:$8 sps:$4 sm:$0xff]   ;;  %v735_v19 = vld [vmem:[#allocation7 + $0x60] ss:$8 sps:$4 sm:$0xff]  }
  0x51   :  { %v736_v20 = vld [vmem:[#allocation7 + $0x74] ss:$8 sps:$4 sm:$0xff]   ;;  %v738_v21 = vld [vmem:[#allocation7 + $0x70] ss:$8 sps:$4 sm:$0xff]   ;;  %v739_v22 = vld [vmem:[#allocation7 + $0x84] ss:$8 sps:$4 sm:$0xff]  }
  0x52   :  { %374 = vmatpush1.bf16.msra.mxu1 %v720_v9  ;;  %v741_v23 = vld [vmem:[#allocation7 + $0x80] ss:$8 sps:$4 sm:$0xff]   ;;  %v742_v24 = vld [vmem:[#allocation7 + $0x94] ss:$8 sps:$4 sm:$0xff]   ;;  %v744_v25 = vld [vmem:[#allocation7 + $0x90] ss:$8 sps:$4 sm:$0xff]  }
  0x53   :  { %627 = vmatmul.mubr.msk.bf16.vlgmr.msra.gmra.mrb[0].mxu0 %vm118_vm0, %v81_v8  ;;  %375 = vmatprep.subr.bf16.mxu1 %v721_v10  ;;  %v745_v26 = vld [vmem:[#allocation7 + $0xa4] ss:$8 sps:$4 sm:$0xff]   ;;  %v747_v27 = vld [vmem:[#allocation7 + $0xa0] ss:$8 sps:$4 sm:$0xff]   ;;  %v748_v28 = vld [vmem:[#allocation7 + $0xb4] ss:$8 sps:$4 sm:$0xff]  }
  0x54   :  { %v750_v29 = vld [vmem:[#allocation7 + $0xb0] ss:$8 sps:$4 sm:$0xff]   ;;  %v751_v30 = vld [vmem:[#allocation7 + $0xc4] ss:$8 sps:$4 sm:$0xff]   ;;  %v753_v31 = vld [vmem:[#allocation7 + $0xc0] ss:$8 sps:$4 sm:$0xff]  }
  0x55   :  { %v754_v32 = vld [vmem:[#allocation7 + $0xd4] ss:$8 sps:$4 sm:$0xff]   ;;  %v756_v33 = vld [vmem:[#allocation7 + $0xd0] ss:$8 sps:$4 sm:$0xff]   ;;  %v757_v34 = vld [vmem:[#allocation7 + $0xe4] ss:$8 sps:$4 sm:$0xff]  }
  0x56   :  { %376 = vmatpush1.bf16.msra.mxu1 %v723_v11  ;;  %v759_v35 = vld [vmem:[#allocation7 + $0xe0] ss:$8 sps:$4 sm:$0xff]   ;;  %v760_v36 = vld [vmem:[#allocation7 + $0xf4] ss:$8 sps:$4 sm:$0xff]   ;;  %v762_v37 = vld [vmem:[#allocation7 + $0xf0] ss:$8 sps:$4 sm:$0xff]  }
  0x57   :  { %377 = vmatprep.subr.bf16.mxu1 %v724_v12  ;;  %v763_v38 = vld [vmem:[#allocation8 + $0x40] sm:$0xff]   ;;  %v765_v40 = vld [vmem:[#allocation8 + $0x48] sm:$0xff]   ;;  %v767_v42 = vld [vmem:[#allocation8 + $0x50] sm:$0xff]   ;;  %v89_v51 = vshrl.u32 %v88_v50, 7 }
  0x58   :  { %v764_v39 = vld [vmem:[#allocation8] sm:$0xff]   ;;  %677 = vmatprep.subr.bf16.mxu0 %v763_v38  ;;  %v766_v41 = vld [vmem:[#allocation8 + $0x8] sm:$0xff]   ;;  %v768_v43 = vld [vmem:[#allocation8 + $0x10] sm:$0xff]  }
  0x59   :  { %678 = vmatpush3.bf16.msra.mxu0 %v764_v39  ;;  %v769_v44 = vld [vmem:[#allocation8 + $0x58] sm:$0xff]   ;;  %v771_v46 = vld [vmem:[#allocation8 + $0x60] sm:$0xff]   ;;  %v773_v48 = vld [vmem:[#allocation8 + $0x68] sm:$0xff]   ;;  %v90_v52 = vsub.s32 0, %v89_v51  ;;  %v94_v54 = vsub.s32 1, %v89_v51 }
  0x5a   :  { %378 = vmatpush1.bf16.msra.mxu1 %v726_v13  ;;  %679 = vmatprep.subr.bf16.mxu0 %v765_v40  ;;  %v770_v45 = vld [vmem:[#allocation8 + $0x18] sm:$0xff]   ;;  %v772_v47 = vld [vmem:[#allocation8 + $0x20] sm:$0xff]   ;;  %v774_v49 = vld [vmem:[#allocation8 + $0x28] sm:$0xff]  }
  0x5b   :  { %379 = vmatprep.subr.bf16.mxu1 %v727_v14  ;;  %v86_v53 = vld [vmem:[%s1028_s2] sm:$0x3]  ;;  %v775_v3 = vld [vmem:[#allocation8 + $0x70] sm:$0xff]  }
  0x5c   :  { %v91_v55 = vrot.slane %v86_v53, %v90_v52  ;;  %v95_v56 = vrot.slane %v86_v53, %v94_v54  ;;  %v776_v4 = vld [vmem:[#allocation8 + $0x30] sm:$0xff]   ;;  %v777_v5 = vld [vmem:[#allocation8 + $0x78] sm:$0xff]  }
  0x5d   :  { %680 = vmatpush3.bf16.msra.mxu0 %v766_v41  ;;  %v778_v6 = vld [vmem:[#allocation8 + $0x38] sm:$0xff]  }
  0x5e   :  { %380 = vmatpush1.bf16.msra.mxu1 %v729_v15  ;;  %681 = vmatprep.subr.bf16.mxu0 %v767_v42  ;;  %v199_v7 = vld [vmem:[%s1030_s4] sm:$0x3]  ;;  %s910_s4 = smov [#allocation10]  }
  0x5f   :  { %381 = vmatprep.subr.bf16.mxu1 %v730_v16  ;;  %v204_v8 = vrot.slane %v199_v7, %v90_v52  ;;  %v208_v9 = vrot.slane %v199_v7, %v94_v54  ;;  %s612_s30 = sshll.u32 %s910_s4, 4  ;;  %s613_s30 = int_to_ptr.vmem [resolvable:$true] %s612_s30 }
  0x60   :  { %p876_p5 = scmp.lt.s32.totalorder %s613_s30, %s613_s30 }
  0x61   :  { %682 = vmatpush3.bf16.msra.mxu0 %v768_v43 }
  0x62   :  { %382 = vmatpush1.bf16.msra.mxu1 %v732_v17  ;;  %683 = vmatprep.subr.bf16.mxu0 %v769_v44 }
  0x63   :  { %383 = vmatprep.subr.bf16.mxu1 %v733_v18 }
  0x65   :  { %684 = vmatpush3.bf16.msra.mxu0 %v770_v45 }
  0x66   :  { %384 = vmatpush1.bf16.msra.mxu1 %v735_v19  ;;  %685 = vmatprep.subr.bf16.mxu0 %v771_v46 }
  0x67   :  { %385 = vmatprep.subr.bf16.mxu1 %v736_v20  ;;  %v592_v20 = vand.u32 127, %v88_v50 }
  0x69   :  { %686 = vmatpush3.bf16.msra.mxu0 %v772_v47  ;;  %vm593_vm1 = vcmp.lt.s32.totalorder %v592_v20, 10 }
  0x6a   :  { %386 = vmatpush1.bf16.msra.mxu1 %v738_v21  ;;  %687 = vmatprep.subr.bf16.mxu0 %v773_v48 }
  0x6b   :  { %387 = vmatprep.subr.bf16.mxu1 %v739_v22 }
  0x6d   :  { %688 = vmatpush3.bf16.msra.mxu0 %v774_v49 }
  0x6e   :  { %388 = vmatpush1.bf16.msra.mxu1 %v741_v23  ;;  %689 = vmatprep.subr.bf16.mxu0 %v775_v3  ;;  %v660_v23 = vld [vmem:[%s1032_s6] ss:$0 sm:$0xff]  ;;  %s871_s6 = scalar_lea.vmem %s613_s30, 128 }
  0x6f   :  { %389 = vmatprep.subr.bf16.mxu1 %v742_v24  ;;  %p872_p4 = scmp.ne.s32.totalorder %s613_s30, %s871_s6  ;;  %p877_p6 = scmp.lt.s32.totalorder %s871_s6, %s871_s6 }
  0x71   :  { %690 = vmatpush3.bf16.msra.mxu0 %v776_v4  ;;  %p878_p7 = por %p877_p6, %p876_p5 }
  0x72   :  { %390 = vmatpush1.bf16.msra.mxu1 %v744_v25  ;;  %691 = vmatprep.subr.bf16.mxu0 %v777_v5 }
  0x73   :  { %391 = vmatprep.subr.bf16.mxu1 %v745_v26  ;;  %p879_p8 = pnand %p878_p7, %p872_p4 }
  0x75   :  { %692 = vmatpush3.bf16.msra.mxu0 %v778_v6 }
  0x76   :  { %392 = vmatpush1.bf16.msra.mxu1 %v747_v27 }
  0x77   :  { %393 = vmatprep.subr.bf16.mxu1 %v748_v28 }
  0x7a   :  { %394 = vmatpush1.bf16.msra.mxu1 %v750_v29 }
  0x7b   :  { %395 = vmatprep.subr.bf16.mxu1 %v751_v30 }
  0x7e   :  { %396 = vmatpush1.bf16.msra.mxu1 %v753_v31 }
  0x7f   :  { %397 = vmatprep.subr.bf16.mxu1 %v754_v32 }
  0x82   :  { %398 = vmatpush1.bf16.msra.mxu1 %v756_v33 }
  0x83   :  { %399 = vmatprep.subr.bf16.mxu1 %v757_v34 }
  0x86   :  { %400 = vmatpush1.bf16.msra.mxu1 %v759_v35 }
  0x87   :  { %401 = vmatprep.subr.bf16.mxu1 %v760_v36 }
  0x8a   :  { %402 = vmatpush1.bf16.msra.mxu1 %v762_v37 }
 0x126   :  { %v156_v57 = vpop.f32.mrb[0].mxu0 }
 0x127   :  { %v157_v58 = vadd.f32 %v156_v57, %v91_v55  ;;  %v158_v59 = vpop.f32.mrb[1].mxu0 }
 0x128   :  { %v159_v60 = vadd.f32 %v158_v59, %v95_v56  ;;  %v160_v61 = vpop.f32.mrb[2].mxu0 }
 0x129   :  { %v163_v62 = vmax.f32 %v157_v58, 0.0  ;;  %v161_v63 = vpop.f32.mrb[3].mxu0 }
 0x12a   :  { %v164_v0 = vmax.f32 %v159_v60, 0.0 }
 0x12b   :  { %v165_v2 = vpack.c.bf16 %v163_v62, %v163_v62 }
 0x12c   :  { %v166_v1 = vpack.c.bf16 %v164_v0, %v164_v0 }
 0x12e   :  { %403 = vmatprep.mubr.bf16.mxu1 %v166_v1 }
 0x12f   :  { %404 = vmatmul.mubr.bf16.vlgmr.msra.gmra.mrb[0].mxu1 %v165_v2 }
 0x202   :  { %v405_v10 = vpop.f32.mrb[0].mxu1 }
 0x203   :  { %v406_v11 = vadd.f32 %v405_v10, %v204_v8  ;;  %v407_v12 = vpop.f32.mrb[1].mxu1 }
 0x204   :  { %v408_v13 = vadd.f32 %v407_v12, %v208_v9  ;;  %v409_v14 = vpop.f32.mrb[2].mxu1 }
 0x205   :  { %v412_v15 = vmax.f32 %v406_v11, 0.0  ;;  %v410_v16 = vpop.f32.mrb[3].mxu1 }
 0x206   :  { %v413_v17 = vmax.f32 %v408_v13, 0.0 }
 0x207   :  { %v414_v19 = vpack.c.bf16 %v412_v15, %v412_v15 }
 0x208   :  { %v415_v18 = vpack.c.bf16 %v413_v17, %v413_v17 }
 0x20a   :  { %583 = vmatprep.mubr.bf16.mxu0 %v415_v18 }
 0x20b   :  { %584 = vmatmul.mubr.bf16.vlgmr.msra.gmra.mrb[4].mxu0 %v414_v19 }
 0x2de   :  { %v693_v21 = vpop.f32.mrb[4].mxu0 }
 0x2df   :  { %v694_v22 = vpop.f32.mrb[5].mxu0 }
 0x2e0   :  { %v695_v24 = vadd.f32 %v694_v22, %v693_v21  ;;  %v696_v25 = vpop.f32.mrb[6].mxu0 }
 0x2e1   :  { %v697_v26 = vpop.f32.mrb[7].mxu0 }
 0x2e2   :  { %v586_v27 = vadd.f32 %v695_v24, %v660_v23 }
 0x2e4   :  { %v594_v28 = vsel %vm593_vm1, %v586_v27, -1e+30 }
 0x2e5   :  { %595 = vmax.xlane.f32.xlu0 %v594_v28 }
 0x372   :  { %v596_v29 = vpop.xlane.xlu0 %595 }
 0x373   :  { %v597_v30 = vsub.f32 %v594_v28, %v596_v29 }
 0x375   :  { %v598_v31 = vmul.f32 1.442695, %v597_v30 }
 0x377   :  { %779 = vpow2.f32 %v598_v31 }
 0x381   :  { %v780_v32 = vpop.eup %779 }
 0x382   :  { %600 = vadd.xlane.f32.xlu0 %v780_v32 }
 0x40f   :  { %v601_v33 = vpop.xlane.xlu0 %600 }
 0x410   :  { %781 = vlog2.f32 %v601_v33 }
 0x41a   :  { %v782_v34 = vpop.eup %781 }
 0x41b   :  { %v603_v35 = vmul.f32 0.6931472, %v782_v34 }
 0x41d   :  { %v604_v36 = vsub.f32 %v597_v30, %v603_v35 }
 0x41f   :  { %605 = vst [vmem:[#allocation10] sm:$0xff] %v604_v36 }
 0x420   :  { %882 = shalt.err (!%p879_p8)
}
 0x421   :  { %s883_s10 = scalar_lea.hbm %s1033_s7, 128 }
 0x422   :  { %p884_p9 = scmp.ne.s32.totalorder %s1033_s7, %s883_s10  ;;  %p887_p10 = scmp.lt.u32.totalorder %s883_s10, %s1033_s7 }
 0x424   :  { %p889_p11 = pnand %p887_p10, %p884_p9 }
 0x426   :  { %892 = shalt.err (!%p889_p11)
}
 0x427   :  { %615 = dma.vmem_to_hbm [thread:$0]  %s613_s30, 128, %s1033_s7, [#allocation4]  }
 0x428   :  { %899 = dma.done.wait [#allocation4], 128  }
 0x429   :  { %900 = vsyncadd [#allocation4], 4294967168 }
 0x42a   :  { %619 = vsyncpa [#allocation3], 1 }
 0x42b   :  { %620 = vsyncpa [#allocation6], 1 }
 0x42c   :  { %621 = vsyncpa [#allocation9], 1 }
 0x42d   :  { %622 = vsyncpa [#allocation4], 1 }

</bundles_post_ra>
